<compile_context>
chip_gen: v7x
topology: tpu7x:2x2x1
jax: 0.10.0
libtpu: 0.0.40
codegen_flags: <defaults>
</compile_context>

<pallas_src>
import functools

import jax
import jax.numpy as jnp
from jax.experimental import pallas as pl
from jax.experimental.pallas import tpu as pltpu


_VMEM_LIMIT = 48 * 1024 * 1024  # safe on v5e/v6e (128 MiB) and v7x (64 MiB)


# ---------------------------------------------------------------------------
# Phase decomposition of ConvTranspose2d(k=3, s=2, p=1, op=1)
#
#   out[2m  ,2n  ] = x[m,n]@W[1,1]
#   out[2m  ,2n+1] = x[m,n]@W[1,2] + x[m,n+1]@W[1,0]
#   out[2m+1,2n  ] = x[m,n]@W[2,1] + x[m+1,n]@W[0,1]
#   out[2m+1,2n+1] = x[m,n]@W[2,2] + x[m,n+1]@W[2,0]
#                  + x[m+1,n]@W[0,2] + x[m+1,n+1]@W[0,0]
# with W[kh,kw] = weight[:, :, kh, kw] (PyTorch layout (Cin, Cout, kH, kW)).
# The kernels pack the shifted inputs along K as [x10 | x00 | x01 | x11], so
# the per-phase weights below are packed along K in the matching order.
# ---------------------------------------------------------------------------


def _pack_taps_wide(weight):
    """(Cin, Cout, 3, 3) -> (9*Cin, Cout), K-packed per output phase."""
    t = lambda kh, kw: weight[:, :, kh, kw]
    return jnp.concatenate([
        t(1, 1),                                  # ee : x00
        t(1, 2), t(1, 0),                         # eo : x00, x01
        t(0, 1), t(2, 1),                         # oe : x10, x00
        t(0, 2), t(2, 2), t(2, 0), t(0, 0),       # oo : x10, x00, x01, x11
    ], axis=0)


def _pack_taps_narrow(weight):
    """(Cin, Cout, 3, 3) -> (4*Cin, 4*Cout): the 4 phases become matmul N."""
    cin, cout = weight.shape[:2]
    t = lambda kh, kw: weight[:, :, kh, kw]
    z = jnp.zeros((cin, cout), weight.dtype)
    # rows: [x10 | x00 | x01 | x11]; cols: [ee | eo | oe | oo]
    col_ee = jnp.concatenate([z,       t(1, 1), z,       z      ], axis=0)
    col_eo = jnp.concatenate([z,       t(1, 2), t(1, 0), z      ], axis=0)
    col_oe = jnp.concatenate([t(0, 1), t(2, 1), z,       z      ], axis=0)
    col_oo = jnp.concatenate([t(0, 2), t(2, 2), t(2, 0), t(0, 0)], axis=0)
    return jnp.concatenate([col_ee, col_eo, col_oe, col_oo], axis=1)


# ---------------------------------------------------------------------------
# Kernels
# ---------------------------------------------------------------------------


def _deconv2x_wide_kernel(x_ref, w_ref, b_ref, o_ref, *,
                          H, W, Cin, Cout, apply_relu):
    """One stride-2 deconv layer with Cout % 128 == 0.

    x_ref : (1, H+1, W+1, Cin)    halo-padded input, one batch element.
    w_ref : (9*Cin, Cout)         K-packed tap weights.
    b_ref : (1, Cout)             f32 bias.
    o_ref : (1, H, 2, W, 2*Cout)  interleaved phases; row-major identical to
                                  the (2H, 2W, Cout) NHWC output of this batch.
    """
    HW = H * W
    xp = x_ref[0]                                   # (H+1, W+1, Cin)
    x00 = xp[:H, :W, :].reshape(HW, Cin)
    x01 = xp[:H, 1:, :].reshape(HW, Cin)
    x10 = xp[1:, :W, :].reshape(HW, Cin)
    x11 = xp[1:, 1:, :].reshape(HW, Cin)
    x_all = jnp.concatenate([x10, x00, x01, x11], axis=-1)      # (HW, 4*Cin)

    w = w_ref[...]
    b = b_ref[...]

    def phase(a, wk):
        p = jnp.dot(a, wk, preferred_element_type=jnp.float32) + b
        if apply_relu:
            p = jnp.maximum(p, 0.0)
        return p.astype(o_ref.dtype).reshape(H, W, Cout)

    p_ee = phase(x00,                       w[0 * Cin:1 * Cin])
    p_eo = phase(x_all[:, 1 * Cin:3 * Cin], w[1 * Cin:3 * Cin])
    p_oe = phase(x_all[:, 0 * Cin:2 * Cin], w[3 * Cin:5 * Cin])
    p_oo = phase(x_all,                     w[5 * Cin:9 * Cin])

    even = jnp.concatenate([p_ee, p_eo], axis=-1)   # (H, W, 2*Cout) rows 2m
    odd = jnp.concatenate([p_oe, p_oo], axis=-1)    # (H, W, 2*Cout) rows 2m+1
    o_ref[0] = jnp.stack([even, odd], axis=1)       # (H, 2, W, 2*Cout)


def _deconv2x_narrow_kernel(x_ref, w_ref, b_ref, o_ref, *,
                            H, W, Cin, Cout, apply_relu):
    """One stride-2 deconv layer with a small Cout (the final Cout=1 layer).

    The 4 output phases ride on the matmul N dimension, so the layer is a
    single MXU dot with K = 4*Cin, N = 4*Cout instead of four N=Cout dots
    with lane-1 masked stores.

    o_ref : (1, H*W, 4*Cout), column = phase*Cout + c, phase order ee,eo,oe,oo.
    """
    HW = H * W
    xp = x_ref[0]
    x00 = xp[:H, :W, :].reshape(HW, Cin)
    x01 = xp[:H, 1:, :].reshape(HW, Cin)
    x10 = xp[1:, :W, :].reshape(HW, Cin)
    x11 = xp[1:, 1:, :].reshape(HW, Cin)
    x_all = jnp.concatenate([x10, x00, x01, x11], axis=-1)      # (HW, 4*Cin)

    p = jnp.dot(x_all, w_ref[...], preferred_element_type=jnp.float32)
    p = p + b_ref[...]
    if apply_relu:
        p = jnp.maximum(p, 0.0)
    o_ref[0] = p.astype(o_ref.dtype)


# ---------------------------------------------------------------------------
# Per-layer wrappers
# ---------------------------------------------------------------------------


def _deconv2x_wide(x_nhwc, weight, bias, *, apply_relu, act_dtype):
    B, H, W, Cin = x_nhwc.shape
    Cout = weight.shape[1]
    # Single halo pad (one copy) -> ONE input block per batch in the kernel.
    xh = jnp.pad(x_nhwc, ((0, 0), (0, 1), (0, 1), (0, 0))).astype(act_dtype)
    w = _pack_taps_wide(weight).astype(act_dtype)                # (9*Cin, Cout)
    b = bias.reshape(1, Cout).astype(jnp.float32)

    out = pl.pallas_call(
        functools.partial(_deconv2x_wide_kernel, H=H, W=W, Cin=Cin, Cout=Cout,
                          apply_relu=apply_relu),
        out_shape=jax.ShapeDtypeStruct((B, H, 2, W, 2 * Cout), act_dtype),
        grid=(B,),
        in_specs=[
            pl.BlockSpec((1, H + 1, W + 1, Cin), lambda b_: (b_, 0, 0, 0)),
            # Constant index maps: weights / bias stay VMEM-resident over B.
            pl.BlockSpec((9 * Cin, Cout), lambda b_: (0, 0)),
            pl.BlockSpec((1, Cout), lambda b_: (0, 0)),
        ],
        out_specs=pl.BlockSpec((1, H, 2, W, 2 * Cout),
                               lambda b_: (b_, 0, 0, 0, 0)),
        compiler_params=pltpu.CompilerParams(
            dimension_semantics=("parallel",),
            vmem_limit_bytes=_VMEM_LIMIT),
    )(xh, w, b)
    # Row-major-identical reinterpretation: (B,H,2,W,2*Cout) == (B,2H,2W,Cout).
    return out.reshape(B, 2 * H, 2 * W, Cout)


def _deconv2x_narrow(x_nhwc, weight, bias, *, apply_relu, act_dtype):
    B, H, W, Cin = x_nhwc.shape
    Cout = weight.shape[1]
    xh = jnp.pad(x_nhwc, ((0, 0), (0, 1), (0, 1), (0, 0))).astype(act_dtype)
    w4 = _pack_taps_narrow(weight).astype(act_dtype)             # (4*Cin, 4*Cout)
    b4 = jnp.tile(bias, 4).reshape(1, 4 * Cout).astype(jnp.float32)

    out = pl.pallas_call(
        functools.partial(_deconv2x_narrow_kernel, H=H, W=W, Cin=Cin,
                          Cout=Cout, apply_relu=apply_relu),
        out_shape=jax.ShapeDtypeStruct((B, H * W, 4 * Cout), jnp.float32),
        grid=(B,),
        in_specs=[
            pl.BlockSpec((1, H + 1, W + 1, Cin), lambda b_: (b_, 0, 0, 0)),
            pl.BlockSpec((4 * Cin, 4 * Cout), lambda b_: (0, 0)),
            pl.BlockSpec((1, 4 * Cout), lambda b_: (0, 0)),
        ],
        out_specs=pl.BlockSpec((1, H * W, 4 * Cout), lambda b_: (b_, 0, 0)),
        compiler_params=pltpu.CompilerParams(
            dimension_semantics=("parallel",),
            vmem_limit_bytes=_VMEM_LIMIT),
    )(xh, w4, b4)
    # Tiny (Cout channels) tensor: un-interleave the phases with plain XLA.
    out = out.reshape(B, H, W, 2, 2, Cout)
    out = jnp.transpose(out, (0, 1, 3, 2, 4, 5))
    return out.reshape(B, 2 * H, 2 * W, Cout)


# ---------------------------------------------------------------------------
# ConvDecoder forward
# ---------------------------------------------------------------------------


def conv_decoder_forward(x, params, *, act_dtype=jnp.bfloat16):
    """ConvDecoder.forward.  x: (B, N, C), N a perfect square.

    Returns (B, 1, 16H, 16W) in NCHW, matching the PyTorch module.
    """
    B, N, C = x.shape
    H = W = int(round(N ** 0.5))
    assert H * W == N, "ConvDecoder expects a square patch grid"
    # torch: x.transpose(1,2).view(B,C,H,W)  ==  NHWC reshape of x.
    y = x.reshape(B, H, W, C)
    n_layers = len(params["weights"])
    for i, (w, b) in enumerate(zip(params["weights"], params["biases"])):
        relu = i < n_layers - 1
        cout = w.shape[1]
        layer = _deconv2x_wide if cout % 128 == 0 else _deconv2x_narrow
        y = layer(y, w, b, apply_relu=relu, act_dtype=act_dtype)
    return jnp.transpose(y.astype(jnp.float32), (0, 3, 1, 2))    # NHWC -> NCHW


def init_params(key, embed_dim):
    """Weights for the fixed up-stack: embed_dim -> 512 -> 256 -> 128 -> 1."""
    dims = [embed_dim, 512, 256, 128, 1]
    weights, biases = [], []
    for i in range(4):
        key, kw, kb = jax.random.split(key, 3)
        cin, cout = dims[i], dims[i + 1]
        # PyTorch ConvTranspose2d weight layout: (Cin, Cout, kH, kW)
        weights.append(0.05 * jax.random.normal(kw, (cin, cout, 3, 3),
                                                dtype=jnp.float32))
        biases.append(0.01 * jax.random.normal(kb, (cout,), dtype=jnp.float32))
    return {"weights": weights, "biases": biases}


def _ref_forward(x, params, *, act_dtype=jnp.float32):
    """Plain-JAX reference via lax.conv_general_dilated, with matching casts."""
    B, N, C = x.shape
    H = W = int(round(N ** 0.5))
    y = jnp.transpose(x, (0, 2, 1)).reshape(B, C, H, W)
    n_layers = len(params["weights"])
    for i, (w, b) in enumerate(zip(params["weights"], params["biases"])):
        # ConvTranspose == conv on 2x-dilated input with flipped, swapped
        # kernel and padding (k-1-p, k-1-p+output_padding) = (1, 2).
        kernel = jnp.transpose(w[:, :, ::-1, ::-1], (1, 0, 2, 3))  # (Cout,Cin,3,3)
        y = jax.lax.conv_general_dilated(
            y.astype(act_dtype), kernel.astype(act_dtype),
            window_strides=(1, 1), padding=((1, 2), (1, 2)),
            lhs_dilation=(2, 2), dimension_numbers=("NCHW", "OIHW", "NCHW"),
            preferred_element_type=jnp.float32,
            precision=jax.lax.Precision.HIGHEST)
        y = y + b.reshape(1, -1, 1, 1)
        if i < n_layers - 1:
            y = jnp.maximum(y, 0.0)
    return y


if __name__ == "__main__":
    key = jax.random.PRNGKey(0)
    k_x, k_p = jax.random.split(key)

    B, N, EMBED_DIM = 2, 16, 32          # H = W = 4 -> output (B, 1, 64, 64)
    x = jax.random.normal(k_x, (B, N, EMBED_DIM), dtype=jnp.float32)
    params = init_params(k_p, EMBED_DIM)
    H = W = int(round(N ** 0.5))

    # 1) Algorithmic check: f32 operands vs. the lax reference.
    out_f32 = jax.block_until_ready(
        conv_decoder_forward(x, params, act_dtype=jnp.float32))
    assert out_f32.shape == (B, 1, 16 * H, 16 * W), out_f32.shape
    ref_f32 = _ref_forward(x, params, act_dtype=jnp.float32)
    assert jnp.allclose(out_f32, ref_f32, atol=5e-3, rtol=5e-3), (
        float(jnp.max(jnp.abs(out_f32 - ref_f32))))

    # 2) Shipping config: bf16 operands, f32 accumulation (matched-cast ref).
    out_bf16 = jax.block_until_ready(
        conv_decoder_forward(x, params, act_dtype=jnp.bfloat16))
    assert out_bf16.shape == (B, 1, 16 * H, 16 * W), out_bf16.shape
    ref_bf16 = _ref_forward(x, params, act_dtype=jnp.bfloat16)
    assert jnp.allclose(out_bf16, ref_bf16, atol=3e-2, rtol=3e-2), (
        float(jnp.max(jnp.abs(out_bf16 - ref_bf16))))

    print("KERNEL_OK")
</pallas_src>

<mosaic_0001>
module attributes {stable_mosaic.version = 11 : i64} {
  func.func @_deconv2x_wide_kernel(%arg0: i32, %arg1: memref<1x5x5x32xf32, #tpu.memory_space<vmem>>, %arg2: memref<288x512xf32, #tpu.memory_space<vmem>>, %arg3: memref<1x512xf32, #tpu.memory_space<vmem>>, %arg4: memref<1x4x2x4x1024xf32, #tpu.memory_space<vmem>>) attributes {dimension_semantics = [#tpu.dimension_semantics<parallel>], iteration_bounds = array<i64: 2>, scalar_prefetch = 0 : i64, scratch_operands = 0 : i64, tpu.core_type = #tpu.core_type<tc>, window_params = [{transform_indices = @transform_0, window_bounds = array<i64: 1, 5, 5, 32>}, {pipeline_mode = #tpu.pipeline_mode<synchronous>, transform_indices = @transform_1, window_bounds = array<i64: 288, 512>}, {pipeline_mode = #tpu.pipeline_mode<synchronous>, transform_indices = @transform_2, window_bounds = array<i64: 1, 512>}, {transform_indices = @transform_3, window_bounds = array<i64: 1, 4, 2, 4, 1024>}]} {
    %c0 = arith.constant 0 : index
    %c0_0 = arith.constant 0 : index
    %c0_1 = arith.constant 0 : index
    %c0_2 = arith.constant 0 : index
    %0 = vector.load %arg1[%c0, %c0_0, %c0_1, %c0_2] : memref<1x5x5x32xf32, #tpu.memory_space<vmem>>, vector<1x5x5x32xf32>
    %1 = vector.shape_cast %0 : vector<1x5x5x32xf32> to vector<5x5x32xf32>
    %2 = vector.extract_strided_slice %1 {offsets = [0, 0, 0], sizes = [4, 4, 32], strides = [1, 1, 1]} : vector<5x5x32xf32> to vector<4x4x32xf32>
    %3 = vector.shape_cast %2 : vector<4x4x32xf32> to vector<16x32xf32>
    %4 = vector.extract_strided_slice %1 {offsets = [0, 1, 0], sizes = [4, 4, 32], strides = [1, 1, 1]} : vector<5x5x32xf32> to vector<4x4x32xf32>
    %5 = vector.shape_cast %4 : vector<4x4x32xf32> to vector<16x32xf32>
    %6 = vector.extract_strided_slice %1 {offsets = [1, 0, 0], sizes = [4, 4, 32], strides = [1, 1, 1]} : vector<5x5x32xf32> to vector<4x4x32xf32>
    %7 = vector.shape_cast %6 : vector<4x4x32xf32> to vector<16x32xf32>
    %8 = vector.extract_strided_slice %1 {offsets = [1, 1, 0], sizes = [4, 4, 32], strides = [1, 1, 1]} : vector<5x5x32xf32> to vector<4x4x32xf32>
    %9 = vector.shape_cast %8 : vector<4x4x32xf32> to vector<16x32xf32>
    %10 = tpu.concatenate %7, %3, %5, %9 in 1 : vector<16x32xf32>, vector<16x32xf32>, vector<16x32xf32>, vector<16x32xf32> -> vector<16x128xf32>
    %c0_3 = arith.constant 0 : index
    %c0_4 = arith.constant 0 : index
    %11 = vector.load %arg2[%c0_3, %c0_4] : memref<288x512xf32, #tpu.memory_space<vmem>>, vector<288x512xf32>
    %c0_5 = arith.constant 0 : index
    %c0_6 = arith.constant 0 : index
    %12 = vector.load %arg3[%c0_5, %c0_6] : memref<1x512xf32, #tpu.memory_space<vmem>>, vector<1x512xf32>
    %13 = vector.extract_strided_slice %11 {offsets = [0, 0], sizes = [32, 512], strides = [1, 1]} : vector<288x512xf32> to vector<32x512xf32>
    %cst = arith.constant dense<0.000000e+00> : vector<16x512xf32>
    %14 = tpu.matmul %3, %13, %cst {dimension_numbers = #tpu.dot_dimension_numbers<[1], [0], [0], [1], [0, 0, 1, 1], [], []>} : vector<16x32xf32>, vector<32x512xf32>, vector<16x512xf32> -> vector<16x512xf32>
    %15 = vector.broadcast %12 : vector<1x512xf32> to vector<16x512xf32>
    %16 = arith.addf %14, %15 : vector<16x512xf32>
    %cst_7 = arith.constant 0.000000e+00 : f32
    %17 = vector.broadcast %cst_7 : f32 to vector<16x512xf32>
    %18 = arith.maximumf %16, %17 : vector<16x512xf32>
    %19 = vector.shape_cast %18 : vector<16x512xf32> to vector<4x4x512xf32>
    %20 = vector.extract_strided_slice %10 {offsets = [0, 32], sizes = [16, 64], strides = [1, 1]} : vector<16x128xf32> to vector<16x64xf32>
    %21 = vector.extract_strided_slice %11 {offsets = [32, 0], sizes = [64, 512], strides = [1, 1]} : vector<288x512xf32> to vector<64x512xf32>
    %cst_8 = arith.constant dense<0.000000e+00> : vector<16x512xf32>
    %22 = tpu.matmul %20, %21, %cst_8 {dimension_numbers = #tpu.dot_dimension_numbers<[1], [0], [0], [1], [0, 0, 1, 1], [], []>} : vector<16x64xf32>, vector<64x512xf32>, vector<16x512xf32> -> vector<16x512xf32>
    %23 = vector.broadcast %12 : vector<1x512xf32> to vector<16x512xf32>
    %24 = arith.addf %22, %23 : vector<16x512xf32>
    %cst_9 = arith.constant 0.000000e+00 : f32
    %25 = vector.broadcast %cst_9 : f32 to vector<16x512xf32>
    %26 = arith.maximumf %24, %25 : vector<16x512xf32>
    %27 = vector.shape_cast %26 : vector<16x512xf32> to vector<4x4x512xf32>
    %28 = vector.extract_strided_slice %10 {offsets = [0, 0], sizes = [16, 64], strides = [1, 1]} : vector<16x128xf32> to vector<16x64xf32>
    %29 = vector.extract_strided_slice %11 {offsets = [96, 0], sizes = [64, 512], strides = [1, 1]} : vector<288x512xf32> to vector<64x512xf32>
    %cst_10 = arith.constant dense<0.000000e+00> : vector<16x512xf32>
    %30 = tpu.matmul %28, %29, %cst_10 {dimension_numbers = #tpu.dot_dimension_numbers<[1], [0], [0], [1], [0, 0, 1, 1], [], []>} : vector<16x64xf32>, vector<64x512xf32>, vector<16x512xf32> -> vector<16x512xf32>
    %31 = vector.broadcast %12 : vector<1x512xf32> to vector<16x512xf32>
    %32 = arith.addf %30, %31 : vector<16x512xf32>
    %cst_11 = arith.constant 0.000000e+00 : f32
    %33 = vector.broadcast %cst_11 : f32 to vector<16x512xf32>
    %34 = arith.maximumf %32, %33 : vector<16x512xf32>
    %35 = vector.shape_cast %34 : vector<16x512xf32> to vector<4x4x512xf32>
    %36 = vector.extract_strided_slice %11 {offsets = [160, 0], sizes = [128, 512], strides = [1, 1]} : vector<288x512xf32> to vector<128x512xf32>
    %cst_12 = arith.constant dense<0.000000e+00> : vector<16x512xf32>
    %37 = tpu.matmul %10, %36, %cst_12 {dimension_numbers = #tpu.dot_dimension_numbers<[1], [0], [0], [1], [0, 0, 1, 1], [], []>} : vector<16x128xf32>, vector<128x512xf32>, vector<16x512xf32> -> vector<16x512xf32>
    %38 = vector.broadcast %12 : vector<1x512xf32> to vector<16x512xf32>
    %39 = arith.addf %37, %38 : vector<16x512xf32>
    %cst_13 = arith.constant 0.000000e+00 : f32
    %40 = vector.broadcast %cst_13 : f32 to vector<16x512xf32>
    %41 = arith.maximumf %39, %40 : vector<16x512xf32>
    %42 = vector.shape_cast %41 : vector<16x512xf32> to vector<4x4x512xf32>
    %43 = tpu.concatenate %19, %27 in 2 : vector<4x4x512xf32>, vector<4x4x512xf32> -> vector<4x4x1024xf32>
    %44 = tpu.concatenate %35, %42 in 2 : vector<4x4x512xf32>, vector<4x4x512xf32> -> vector<4x4x1024xf32>
    %45 = vector.shape_cast %43 : vector<4x4x1024xf32> to vector<4x1x4x1024xf32>
    %46 = vector.shape_cast %44 : vector<4x4x1024xf32> to vector<4x1x4x1024xf32>
    %47 = tpu.concatenate %45, %46 in 1 : vector<4x1x4x1024xf32>, vector<4x1x4x1024xf32> -> vector<4x2x4x1024xf32>
    %c0_14 = arith.constant 0 : index
    %c0_15 = arith.constant 0 : index
    %c0_16 = arith.constant 0 : index
    %c0_17 = arith.constant 0 : index
    %c0_18 = arith.constant 0 : index
    %48 = vector.load %arg4[%c0_14, %c0_15, %c0_16, %c0_17, %c0_18] : memref<1x4x2x4x1024xf32, #tpu.memory_space<vmem>>, vector<1x4x2x4x1024xf32>
    %49 = vector.shape_cast %48 : vector<1x4x2x4x1024xf32> to vector<4x2x4x1024xf32>
    %50 = vector.shape_cast %47 : vector<4x2x4x1024xf32> to vector<1x4x2x4x1024xf32>
    tpu.vector_store %arg4[%c0_14, %c0_15, %c0_16, %c0_17, %c0_18], %50 {strides = array<i32>} : memref<1x4x2x4x1024xf32, #tpu.memory_space<vmem>>, vector<1x4x2x4x1024xf32>,
    return
  }
  func.func @transform_0(%arg0: i32) -> (i32, i32, i32, i32) {
    %c0_i32 = arith.constant 0 : i32
    %c0_i32_0 = arith.constant 0 : i32
    %c0_i32_1 = arith.constant 0 : i32
    %c0_i32_2 = arith.constant 0 : i32
    return %arg0, %c0_i32, %c0_i32_0, %c0_i32_1 : i32, i32, i32, i32
  }
  func.func @transform_1(%arg0: i32) -> (i32, i32) {
    %c0_i32 = arith.constant 0 : i32
    %c0_i32_0 = arith.constant 0 : i32
    %c0_i32_1 = arith.constant 0 : i32
    return %c0_i32, %c0_i32_0 : i32, i32
  }
  func.func @transform_2(%arg0: i32) -> (i32, i32) {
    %c0_i32 = arith.constant 0 : i32
    %c0_i32_0 = arith.constant 0 : i32
    %c0_i32_1 = arith.constant 0 : i32
    return %c0_i32, %c0_i32_0 : i32, i32
  }
  func.func @transform_3(%arg0: i32) -> (i32, i32, i32, i32, i32) {
    %c0_i32 = arith.constant 0 : i32
    %c0_i32_0 = arith.constant 0 : i32
    %c0_i32_1 = arith.constant 0 : i32
    %c0_i32_2 = arith.constant 0 : i32
    %c0_i32_3 = arith.constant 0 : i32
    return %arg0, %c0_i32, %c0_i32_0, %c0_i32_1, %c0_i32_2 : i32, i32, i32, i32, i32
  }
}

</mosaic_0001>

<bundles_post_ra>
// kernel: tpu_custom_call.1
= control target key start
LH: loop header
LB: loop body
LE: loop exit
PB: predicated region body
PF: predicated region fallthrough
CT: control target
= control target key end

     0   :  { %8 = vsyncpa [#allocation3], 0  ;;  %s2138_s0 = inlined_call_operand.vmem [shape: f32[2,5,5,32], index: 0, kind: input, shape index: {}]   ;;  %s2139_s1 = inlined_call_operand.hbm [shape: f32[288,512], index: 1, kind: input, shape index: {}]   ;;  %s2140_s2 = inlined_call_operand.vmem [shape: f32[1,512], index: 2, kind: input, shape index: {}]   ;;  %s2141_s3 = inlined_call_operand.hbm [shape: f32[2,4,2,4,1024], index: 3, kind: output, shape index: {}]  }
   0x1   :  { %9 = vsyncpa [#allocation4], 0 }
   0x2   :  { %11 = vsyncpa [#allocation4 + $0x1], 0  ;;  %s1802_s12 = smov 0   ;;  %s1804_s13 = smov 0  }
   0x3   :  { %s1806_s14 = smov 0   ;;  %s1808_s15 = smov 0  }
   0x4 LB: > { %s1823_s16 = sadd.s32 4294967295, %s1771_s15   ;;  %s1371_s17 = sadd.s32 4294967294, %s1771_s15   ;;  %s1771_s15 = sphi %s1808_s15, %s2159_s15   ;;  %s1767_s14 = sphi %s1806_s14, %s2158_s14   ;;  %s1763_s13 = sphi %s1804_s13, %s2157_s13   ;;  %s1759_s12 = sphi %s1802_s12, %s2156_s12  }
   0x5   : > { %s1827_s18 = sadd.s32 1, %s1771_s15   ;;  %s92_s19 = sadd.s32 1, %s1767_s14 }
   0x6   : > { %s89_s20 = ssub.s32 %s1771_s15, %s1827_s18  ;;  %p102_p0 = scmp.ne.s32.totalorder %s1767_s14, %s1763_s13 }
   0x7   : > { %p90_p1 = scmp.eq.s32.totalorder %s89_s20, 0  ;;  %p103_p2 = scmp.eq.s32.totalorder %s1823_s16, 1 }
   0x8   : > { %p108_p3 = scmp.ne.s32.totalorder %s1763_s13, %s1759_s12  ;;  %p109_p4 = scmp.eq.s32.totalorder %s1371_s17, 1 }
   0x9   : > { %s1838_s21 = scalar_select %p90_p1, %s1767_s14, %s92_s19  }
   0xa   : > { %p1840_p5 = por %p103_p2, %p102_p0  ;;  %p1844_p6 = por %p109_p4, %p108_p3 }
   0xb   : > { %p1372_p7 = scmp.ge.s32.totalorder %s1771_s15, 1  ;;  %p116_p8 = scmp.lt.s32.totalorder %s1771_s15, 3 }
   0xc   : > { %s2145_s22 = scalar_select %p1840_p5, 1, 0 }
   0xd   : > { %s2146_s23 = scalar_select %p1844_p6, 1, 0 }
   0xe   : > { %p2142_p9 = scmp.eq.s32.totalorder %s1823_s16, 0  ;;  %p1851_p10 = pnand %p1372_p7, %p116_p8 }
   0xf   : > { %s1773_s25 = smov [#allocation2]   ;;  %s1677_s30 = scalar_lea.hbm %s2139_s1, 18432 }
  0x10   : > { %s2147_s24 = scalar_select %p1851_p10, 1, 0 }
  0x11   : > { %s128_s26 = sshll.u32 %s1773_s25, 4  ;;  %p1617_p11 = pneg %p1851_p10  ;;  %s129_s26 = int_to_ptr.vmem [resolvable:$true] %s128_s26 }
  0x12   : > { %p1678_p13 = scmp.ne.s32.totalorder %s2139_s1, %s1677_s30  ;;  %p1684_p3 = scmp.lt.u32.totalorder %s1677_s30, %s2139_s1 }
  0x13   : > { %p1859_p12 = pnand %p2142_p9, %p1617_p11 }
  0x15   : > { %p1679_p0 = pneg %p1859_p12 }
  0x17   : > { %p1680_p1 = pnand %p1679_p0, %p1678_p13 }
  0x19   : > { %p1681_p2 = pneg %p1680_p1 }
  0x1b   : > { %p1686_p4 = pnand %p1684_p3, %p1681_p2 }
  0x1d   : > { %1689 = shalt.err (!%p1686_p4)
}
  0x1e   : > { %s1690_s8 = scalar_lea.vmem %s129_s26, 18432  ;;  %p1698_p9 = scmp.lt.s32.totalorder %s129_s26, %s129_s26 }
  0x1f   : > { %p1691_p7 = scmp.ne.s32.totalorder %s129_s26, %s1690_s8  ;;  %p1699_p6 = scmp.lt.s32.totalorder %s1690_s8, %s1690_s8 }
  0x21   : > { %p1693_p8 = pnand %p1691_p7, %p1679_p0  ;;  %p1700_p5 = por %p1699_p6, %p1698_p9 }
  0x23   : > { %p1694_p11 = pneg %p1693_p8 }
  0x25   : > { %p1701_p10 = pnand %p1700_p5, %p1694_p11 }
  0x27   : > { %1704 = shalt.err (!%p1701_p10)
}
  0x28   : > { %s1774_s9 = smov 512   ;;  %s1775_s10 = smov 32  }
  0x29   : > { %1620 = dma.hbm_to_vmem [thread:$0]  (!%p1859_p12), %s2139_s1, 18432, %s129_s26, [#allocation3], %s1774_s9, %s1774_s9, %s1775_s10  }
  0x2a   : > { %p2149_p13 = scmp.ne.s32.totalorder %s2147_s24, 0 }
  0x2b   : > { %p2150_p1 = scmp.eq.s32.totalorder (!%p2149_p13), %s1823_s16, 0 }
  0x2c   : > { %155 = sbr.rel (%p2149_p13) target bundleno = 587 (0x24b), region = 32 }
  0x33   : > { %1750 = dma.done.wait (%p2150_p1), [#allocation3], 18432   ;;  %p2151_p0 = pmov %p2150_p1 }
  0x34   : > { %p179_p5 = scmp.lt.s32.totalorder %s1823_s16, 1  ;;  %vm197_vm0 = vcmask 1042432   ;;  %vm198_vm1 = vcmask 1046532   ;;  %s1776_s24 = smov 32   ;;  %v260_v25 = vld [vmem:[#allocation2 + $0x8] sm:$0xff]  ;;  %v262_v27 = vld [vmem:[#allocation2 + $0x18] sm:$0xff] }
  0x35   : > { %1752 = vsyncadd (%p2151_p0), [#allocation3], 4294948864  ;;  %v264_v26 = vld [vmem:[#allocation2 + $0x28] sm:$0xff]  ;;  %v266_v32 = vld [vmem:[#allocation2 + $0x38] sm:$0xff]  ;;  %s1777_s26 = smov 64   ;;  %s1778_s29 = smov 96  }
  0x36   : > { %s180_s19 = scalar_select %p179_p5, %s1823_s16, 1  ;;  %vm1903_vm2 = vmor %vm197_vm0, %vm198_vm1  ;;  %v259_v33 = vld [vmem:[#allocation2] sm:$0xff]  ;;  %v1466_v36 = vpack.c.bf16 %v264_v26, %v260_v25  ;;  %v1474_v37 = vpack.c.bf16 %v266_v32, %v262_v27  ;;  %v261_v38 = vld [vmem:[#allocation2 + $0x10] sm:$0xff]  ;;  %v1779_v9 = vmov 0.0   ;;  %vm250_vm3 = vcmask 261120  }
  0x37   : > { %v263_v34 = vld [vmem:[#allocation2 + $0x20] sm:$0xff]  ;;  %v265_v39 = vld [vmem:[#allocation2 + $0x30] sm:$0xff]  ;;  %v268_v40 = vld [vmem:[#allocation2 + $0x48] sm:$0xff]  ;;  %493 = vmatprep.mubr.f32.mxu0 %v1779_v9  ;;  %570 = vmatprep.mubr.f32.mxu1 %v1779_v9  ;;  %vm253_vm4 = vcmask 523264   ;;  %vm256_vm5 = vcmask 785408   ;;  %s176_s5 = sand.u32 1, %s1763_s13  }
  0x38   : > { %s1610_s20 = smul.u32 40, %s180_s19  ;;  %v1468_v42 = vpack.c.bf16 %v263_v34, %v259_v33  ;;  %v1476_v43 = vpack.c.bf16 %v265_v39, %v261_v38  ;;  %v272_v44 = vld [vmem:[#allocation2 + $0x68] sm:$0xff]  ;;  %v270_v45 = vld [vmem:[#allocation2 + $0x58] sm:$0xff]  ;;  %1467 = vmatprep.subr.bf16.mxu0 %v1466_v36  ;;  %v267_v50 = vld [vmem:[#allocation2 + $0x40] sm:$0xff]  ;;  %1475 = vmatprep.subr.bf16.mxu1 %v1474_v37  ;;  %s1377_s6 = sshll.u32 %s176_s5, 8 }
  0x39   : > { %v274_v46 = vld [vmem:[#allocation2 + $0x78] sm:$0xff]  ;;  %v1470_v48 = vpack.c.bf16 %v272_v44, %v268_v40  ;;  %v271_v51 = vld [vmem:[#allocation2 + $0x60] sm:$0xff]  ;;  %v269_v52 = vld [vmem:[#allocation2 + $0x50] sm:$0xff]  ;;  %s2001_s7 = scalar_lea.vmem [#allocation5], %s1377_s6  ;;  %s1465_s8 = sshll.u32 %s1823_s16, 12 }
  0x3a   : > { %s183_s28 = scalar_lea.vmem %s2138_s0, %s1610_s20  ;;  %v1478_v49 = vpack.c.bf16 %v274_v46, %v270_v45  ;;  %1469 = vmatpush1.bf16.msra.mxu0 %v1468_v42  ;;  %v1472_v54 = vpack.c.bf16 %v271_v51, %v267_v50  ;;  %v273_v55 = vld [vmem:[#allocation2 + $0x70] sm:$0xff]  ;;  %v276_v56 = vld [vmem:[#allocation2 + $0x88] sm:$0xff]  ;;  %1477 = vmatpush1.bf16.msra.mxu1 %v1476_v43  ;;  %v278_v60 = vld [vmem:[#allocation2 + $0x98] sm:$0xff]  ;;  %s1297_s9 = sshll.u32 %s2001_s7, 4  ;;  %s2088_s9 = int_to_ptr.vmem [resolvable:$true] %s1297_s9 }
  0x3b   : > { %v184_v0 = vld [vmem:[%s183_s28] sm:$0x1f]  ;;  %v1890_v1 = vld [vmem:[%s183_s28 + $0x8] sm:$0x1f]  ;;  %v1892_v2 = vld [vmem:[%s183_s28 + $0x10] sm:$0x1f]  ;;  %1471 = vmatprep.subr.bf16.mxu0 %v1470_v48  ;;  %v1480_v58 = vpack.c.bf16 %v273_v55, %v269_v52  ;;  %s2086_s17 = scalar_lea.hbm %s2141_s3, %s1465_s8 }
  0x3c   : > { %v1895_v3 = vcombine.low %v184_v0, %v1890_v1  ;;  %v193_v4 = vcombine.high %v184_v0, %v184_v0  ;;  %v1379_v5 = vrot.slane %v184_v0, 9  ;;  %v194_v6 = vcombine.high %v1890_v1, %v1890_v1  ;;  %v1899_v7 = vld [vmem:[%s183_s28 + $0x18] sm:$0x1f]  ;;  %v1901_v8 = vld [vmem:[%s183_s28 + $0x20] sm:$0x1f]  ;;  %v282_v61 = vld [vmem:[#allocation2 + $0xb8] sm:$0xff]  ;;  %1479 = vmatprep.subr.bf16.mxu1 %v1478_v49 }
  0x3d   : > { %v1380_v10 = vrot.slane %v1890_v1, 9  ;;  %v195_v11 = vcombine.high %v1892_v2, %v1892_v2  ;;  %v196_v12 = vcombine.high %v1899_v7, %v1899_v7  ;;  %v1381_v13 = vrot.slane %v1892_v2, 9  ;;  %v280_v57 = vld [vmem:[#allocation2 + $0xa8] sm:$0xff]  ;;  %v275_v62 = vld [vmem:[#allocation2 + $0x80] sm:$0xff]  ;;  %v294_v26 = vld [vmem:[#allocation2 + $0x118] sm:$0xff]  ;;  %s2096_s16 = scalar_lea.sflag [#allocation4], %s176_s5 }
  0x3e   : > { %228 = vrot.lane.b32.xlu0 %v1895_v3, %s1776_s24  ;;  %v202_v14 = vrot.slane %v193_v4, 5  ;;  %v206_v15 = vrot.slane %v194_v6, 5  ;;  %v1382_v16 = vrot.slane %v1899_v7, 9  ;;  %v217_v19 = vcombine.high %v1901_v8, %v1901_v8  ;;  %v279_v0 = vld [vmem:[#allocation2 + $0xa0] sm:$0xff]  ;;  %v277_v4 = vld [vmem:[#allocation2 + $0x90] sm:$0xff]  ;;  %1473 = vmatpush1.bf16.msra.mxu0 %v1472_v54  ;;  %v296_v25 = vld [vmem:[#allocation2 + $0x128] sm:$0xff] }
  0x3f   : > { %v210_v17 = vrot.slane %v195_v11, 5  ;;  %v214_v18 = vrot.slane %v196_v12, 5  ;;  %v1383_v20 = vrot.slane %v1901_v8, 9  ;;  %v222_v23 = vcombine.low %v1890_v1, %v1892_v2  ;;  %v288_v11 = vld [vmem:[#allocation2 + $0xe8] sm:$0xff]  ;;  %v286_v12 = vld [vmem:[#allocation2 + $0xd8] sm:$0xff]  ;;  %1481 = vmatpush1.bf16.msra.mxu1 %v1480_v58  ;;  %v295_v32 = vld [vmem:[#allocation2 + $0x120] sm:$0xff] }
  0x40   : > { %v203_v21 = vsel %vm1903_vm2, %v1379_v5, %v202_v14  ;;  %v207_v22 = vsel %vm1903_vm2, %v1380_v10, %v206_v15  ;;  %v223_v24 = vcombine.low %v1899_v7, %v1901_v8  ;;  %v220_v31 = vrot.slane %v217_v19, 5  ;;  %v281_v5 = vld [vmem:[#allocation2 + $0xb0] sm:$0xff]  ;;  %v284_v10 = vld [vmem:[#allocation2 + $0xc8] sm:$0xff]  ;;  %v290_v14 = vld [vmem:[#allocation2 + $0xf8] sm:$0xff]  ;;  %s1705_s19 = scalar_lea.vmem %s2088_s9, 4096  ;;  %p2154_p9 = scmp.ne.s32.totalorder %s2145_s22, 0 }
  0x41   : > { %v234_v28 = vcombine.low %v203_v21, %v207_v22  ;;  %v211_v29 = vsel %vm1903_vm2, %v1381_v13, %v210_v17  ;;  %v1931_v30 = vsel %vm1903_vm2, %v1382_v16, %v214_v18  ;;  %v1938_v47 = vcombine.low %v1892_v2, %v1899_v7  ;;  %v283_v17 = vld [vmem:[#allocation2 + $0xc0] sm:$0xff]  ;;  %v285_v19 = vld [vmem:[#allocation2 + $0xd0] sm:$0xff]  ;;  %1384 = vmatmul.mubr.msk.f32.vlgmr.msra.gmra.mrb[0].mxu0 %vm250_vm3, %v1895_v3  ;;  %v298_v27 = vld [vmem:[#allocation2 + $0x138] sm:$0xff]  ;;  %p1706_p6 = scmp.ne.s32.totalorder %s2088_s9, %s1705_s19  ;;  %s1780_s20 = smov [#allocation5]  }
  0x42   : > { %v242_v35 = vcombine.low %v207_v22, %v211_v29  ;;  %v235_v41 = vcombine.low %v211_v29, %v1931_v30  ;;  %v221_v53 = vsel %vm1903_vm2, %v1383_v20, %v220_v31  ;;  %v1482_v59 = vpack.c.bf16 %v280_v57, %v276_v56  ;;  %v287_v18 = vld [vmem:[#allocation2 + $0xe0] sm:$0xff]  ;;  %v289_v21 = vld [vmem:[#allocation2 + $0xf0] sm:$0xff]  ;;  %v292_v22 = vld [vmem:[#allocation2 + $0x108] sm:$0xff]  ;;  %1386 = vmatmul.mubr.msk.f32.vlgmr.msra.gmra.mrb[0].mxu1 %vm250_vm3, %v1895_v3  ;;  %s1709_s25 = sshll.u32 %s1780_s20, 4  ;;  %s1710_s25 = int_to_ptr.vmem [resolvable:$false] %s1709_s25 }
  0x43   : > { %236 = vrot.lane.b32.xlu0 %v234_v28, %s1777_s26  ;;  %v1498_v63 = vpack.c.bf16 %v282_v61, %v278_v60  ;;  %v243_v6 = vcombine.low %v1931_v30, %v221_v53  ;;  %v1484_v13 = vpack.c.bf16 %v279_v0, %v275_v62  ;;  %v1500_v15 = vpack.c.bf16 %v281_v5, %v277_v4  ;;  %v291_v31 = vld [vmem:[#allocation2 + $0x100] sm:$0xff]  ;;  %v293_v33 = vld [vmem:[#allocation2 + $0x110] sm:$0xff]  ;;  %v300_v36 = vld [vmem:[#allocation2 + $0x148] sm:$0xff]  ;;  %p1707_p10 = pnand %p1706_p6, %p2154_p9  ;;  %s1711_s27 = scalar_lea.vmem %s1710_s25, 8192 }
  0x44   : > { %244 = vrot.lane.b32.xlu1 %v242_v35, %s1778_s29  ;;  %1483 = vmatprep.subr.bf16.mxu0 %v1482_v59  ;;  %v1486_v16 = vpack.c.bf16 %v288_v11, %v284_v10  ;;  %v1502_v20 = vpack.c.bf16 %v290_v14, %v286_v12  ;;  %v1488_v28 = vpack.c.bf16 %v287_v18, %v283_v17  ;;  %v297_v35 = vld [vmem:[#allocation2 + $0x130] sm:$0xff]  ;;  %v304_v37 = vld [vmem:[#allocation2 + $0x168] sm:$0xff]  ;;  %v302_v3 = vld [vmem:[#allocation2 + $0x158] sm:$0xff]  ;;  %v405_v0 = vlaneseq  ;;  %p1712_p2 = scmp.lt.s32.totalorder %s2088_s9, %s1710_s25  ;;  %p1713_p3 = scmp.lt.s32.totalorder %s1711_s27, %s1705_s19 }
  0x45   : > { %1499 = vmatprep.subr.bf16.mxu1 %v1498_v63  ;;  %1485 = vmatpush1.bf16.msra.mxu0 %v1484_v13  ;;  %v1504_v29 = vpack.c.bf16 %v289_v21, %v285_v19  ;;  %v1490_v30 = vpack.c.bf16 %v296_v25, %v292_v22  ;;  %v1506_v34 = vpack.c.bf16 %v298_v27, %v294_v26  ;;  %v306_v38 = vld [vmem:[#allocation2 + $0x178] sm:$0xff]  ;;  %v299_v42 = vld [vmem:[#allocation2 + $0x140] sm:$0xff]  ;;  %v301_v44 = vld [vmem:[#allocation2 + $0x150] sm:$0xff]  ;;  %p1708_p12 = pneg %p1707_p10 }
  0x46   : > { %1501 = vmatpush1.bf16.msra.mxu1 %v1500_v15  ;;  %1487 = vmatprep.subr.bf16.mxu0 %v1486_v16  ;;  %v1492_v39 = vpack.c.bf16 %v295_v32, %v291_v31  ;;  %v1508_v40 = vpack.c.bf16 %v297_v35, %v293_v33  ;;  %v303_v43 = vld [vmem:[#allocation2 + $0x160] sm:$0xff]  ;;  %v1510_v45 = vpack.c.bf16 %v306_v38, %v302_v3  ;;  %v305_v46 = vld [vmem:[#allocation2 + $0x170] sm:$0xff]  ;;  %v308_v48 = vld [vmem:[#allocation2 + $0x188] sm:$0xff]  ;;  %v406_v4 = vshrl.u32 %v405_v0, 7  ;;  %p1714_p4 = por %p1713_p3, %p1712_p2 }
  0x47   : > { %238 = vrot.lane.b32.xlu0 %v235_v41, %s1777_s26  ;;  %1503 = vmatprep.subr.bf16.mxu1 %v1502_v20  ;;  %v1494_v41 = vpack.c.bf16 %v304_v37, %v300_v36  ;;  %v312_v49 = vld [vmem:[#allocation2 + $0x1a8] sm:$0xff]  ;;  %v310_v50 = vld [vmem:[#allocation2 + $0x198] sm:$0xff]  ;;  %v1512_v52 = vpack.c.bf16 %v305_v46, %v301_v44  ;;  %v313_v35 = vld [vmem:[#allocation2 + $0x1b0] sm:$0xff] }
  0x48   : > { %230 = vrot.lane.b32.xlu1 %v1938_v47, %s1776_s24  ;;  %499 = vmatprep.mubr.f32.mxu0 %v1779_v9  ;;  %v314_v51 = vld [vmem:[#allocation2 + $0x1b8] sm:$0xff]  ;;  %v1514_v53 = vpack.c.bf16 %v312_v49, %v308_v48  ;;  %v407_v5 = vsub.s32 0, %v406_v4  ;;  %v415_v7 = vsub.s32 2, %v406_v4  ;;  %v411_v8 = vsub.s32 1, %v406_v4  ;;  %v316_v36 = vld [vmem:[#allocation2 + $0x1c8] sm:$0xff]  ;;  %p1715_p7 = pnand %p1714_p4, %p1708_p12 }
  0x49   : > { %576 = vmatprep.mubr.f32.mxu1 %v1779_v9  ;;  %1385 = vmatmul.mubr.msk.f32.gmra.mrb[2].mxu0 %vm250_vm3, %v1938_v47  ;;  %v1530_v54 = vpack.c.bf16 %v314_v51, %v310_v50  ;;  %v419_v10 = vsub.s32 3, %v406_v4  ;;  %v330_v0 = vld [vmem:[#allocation2 + $0x238] sm:$0xff] }
  0x4a   : > { %1489 = vmatpush1.bf16.msra.mxu0 %v1488_v28  ;;  %1387 = vmatmul.mubr.msk.f32.gmra.mrb[2].mxu1 %vm250_vm3, %v1938_v47  ;;  %v1496_v47 = vpack.c.bf16 %v303_v43, %v299_v42  ;;  %v307_v28 = vld [vmem:[#allocation2 + $0x180] sm:$0xff]  ;;  %v318_v42 = vld [vmem:[#allocation2 + $0x1d8] sm:$0xff] }
  0x4b   : > { %1505 = vmatpush1.bf16.msra.mxu1 %v1504_v29  ;;  %1491 = vmatprep.subr.bf16.mxu0 %v1490_v30  ;;  %v311_v29 = vld [vmem:[#allocation2 + $0x1a0] sm:$0xff]  ;;  %v322_v43 = vld [vmem:[#allocation2 + $0x1f8] sm:$0xff] }
  0x4c   : > { %246 = vrot.lane.b32.xlu1 %v243_v6, %s1778_s29  ;;  %1507 = vmatprep.subr.bf16.mxu1 %v1506_v34  ;;  %v403_v6 = vld [vmem:[%s2140_s2] sm:$0xf]  ;;  %v1516_v51 = vpack.c.bf16 %v311_v29, %v307_v28 }
  0x4d   : > { %681 = vmatprep.mubr.f32.mxu0 %v1779_v9  ;;  %758 = vmatprep.mubr.f32.mxu1 %v1779_v9  ;;  %v1984_v11 = vrot.slane %v403_v6, %v415_v7  ;;  %v1986_v12 = vrot.slane %v403_v6, %v411_v8  ;;  %v1989_v13 = vrot.slane %v403_v6, %v419_v10  ;;  %v309_v34 = vld [vmem:[#allocation2 + $0x190] sm:$0xff]  ;;  %v323_v8 = vld [vmem:[#allocation2 + $0x200] sm:$0xff] }
  0x4e   : > { %1493 = vmatpush1.bf16.msra.mxu0 %v1492_v39  ;;  %v327_v10 = vld [vmem:[#allocation2 + $0x220] sm:$0xff] }
  0x4f   : > { %1509 = vmatpush1.bf16.msra.mxu1 %v1508_v40  ;;  %1495 = vmatprep.subr.bf16.mxu0 %v1494_v41  ;;  %v320_v41 = vld [vmem:[#allocation2 + $0x1e8] sm:$0xff] }
  0x50   : > { %1511 = vmatprep.subr.bf16.mxu1 %v1510_v45 }
  0x52   : > { %1497 = vmatpush1.bf16.msra.mxu0 %v1496_v47  ;;  %v1532_v47 = vpack.c.bf16 %v313_v35, %v309_v34  ;;  %v344_v34 = vld [vmem:[#allocation2 + $0x2a8] sm:$0xff]  ;;  %v342_v35 = vld [vmem:[#allocation2 + $0x298] sm:$0xff] }
  0x53   : > { %1513 = vmatpush1.bf16.msra.mxu1 %v1512_v52  ;;  %1515 = vmatprep.subr.bf16.mxu0 %v1514_v53  ;;  %v315_v52 = vld [vmem:[#allocation2 + $0x1c0] sm:$0xff] }
  0x54   : > { %1531 = vmatprep.subr.bf16.mxu1 %v1530_v54  ;;  %v319_v53 = vld [vmem:[#allocation2 + $0x1e0] sm:$0xff] }
  0xb0   : > { %v229_v55 = vpop.permute.xlu0 %228 }
  0xb1   : > { %v251_v56 = vsel %vm250_vm3, %v222_v23, %v229_v55  ;;  %v1518_v55 = vpack.c.bf16 %v320_v41, %v316_v36  ;;  %v346_v36 = vld [vmem:[#allocation2 + $0x2b8] sm:$0xff]  ;;  %v343_v41 = vld [vmem:[#allocation2 + $0x2a0] sm:$0xff] }
  0xb5   : > { %v237_v57 = vpop.permute.xlu0 %236 }
  0xb6   : > { %v254_v58 = vsel %vm253_vm4, %v251_v56, %v237_v57  ;;  %v245_v59 = vpop.permute.xlu1 %244  ;;  %v1534_v56 = vpack.c.bf16 %v322_v43, %v318_v42  ;;  %v317_v57 = vld [vmem:[#allocation2 + $0x1d0] sm:$0xff] }
  0xb7   : > { %v1966_v60 = vsel %vm256_vm5, %v254_v58, %v245_v59  ;;  %v321_v58 = vld [vmem:[#allocation2 + $0x1f0] sm:$0xff]  ;;  %v324_v59 = vld [vmem:[#allocation2 + $0x208] sm:$0xff] }
  0xb8   : > { %609 = vrot.lane.b32.xlu0 %v1966_v60, %s1778_s29  ;;  %v1536_v7 = vpack.c.bf16 %v321_v58, %v317_v57  ;;  %v341_v42 = vld [vmem:[#allocation2 + $0x290] sm:$0xff]  ;;  %v360_v57 = vld [vmem:[#allocation2 + $0x328] sm:$0xff]  ;;  %v358_v58 = vld [vmem:[#allocation2 + $0x318] sm:$0xff] }
  0xb9   : > { %v239_v61 = vpop.permute.xlu0 %238  ;;  %v345_v43 = vld [vmem:[#allocation2 + $0x2b0] sm:$0xff] }
  0xba   : > { %v231_v62 = vpop.permute.xlu1 %230 }
  0xbb   : > { %v252_v63 = vsel %vm250_vm3, %v223_v24, %v231_v62  ;;  %v1982_v24 = vrot.slane %v403_v6, %v407_v5  ;;  %v1520_v6 = vpack.c.bf16 %v319_v53, %v315_v52  ;;  %v349_v52 = vld [vmem:[#allocation2 + $0x2d0] sm:$0xff] }
  0xbc   : > { %v255_v1 = vsel %vm253_vm4, %v252_v63, %v239_v61  ;;  %v353_v53 = vld [vmem:[#allocation2 + $0x2f0] sm:$0xff] }
  0xbe   : > { %v247_v2 = vpop.permute.xlu1 %246 }
  0xbf   : > { %v1975_v23 = vsel %vm256_vm5, %v255_v1, %v247_v2  ;;  %v328_v1 = vld [vmem:[#allocation2 + $0x228] sm:$0xff]  ;;  %v326_v2 = vld [vmem:[#allocation2 + $0x218] sm:$0xff] }
  0xc0   : > { %611 = vrot.lane.b32.xlu1 %v1975_v23, %s1778_s29 }
 0x114   : > { %v495_v14 = vpop.f32.mrb[0].mxu0 }
 0x115   : > { %v496_v15 = vadd.f32 %v495_v14, %v1982_v24  ;;  %v572_v16 = vpop.f32.mrb[0].mxu1  ;;  %v497_v17 = vpop.f32.mrb[1].mxu0  ;;  %v1522_v14 = vpack.c.bf16 %v328_v1, %v324_v59  ;;  %v362_v59 = vld [vmem:[#allocation2 + $0x338] sm:$0xff]  ;;  %v359_v1 = vld [vmem:[#allocation2 + $0x320] sm:$0xff] }
 0x116   : > { %v573_v18 = vadd.f32 %v572_v16, %v1984_v11  ;;  %v498_v19 = vadd.f32 %v497_v17, %v1986_v12  ;;  %v574_v20 = vpop.f32.mrb[1].mxu1  ;;  %v325_v16 = vld [vmem:[#allocation2 + $0x210] sm:$0xff] }
 0x117   : > { %v583_v21 = vmax.f32 %v496_v15, 0.0  ;;  %v575_v22 = vadd.f32 %v574_v20, %v1989_v13  ;;  %v1538_v15 = vpack.c.bf16 %v330_v0, %v326_v2  ;;  %v329_v17 = vld [vmem:[#allocation2 + $0x230] sm:$0xff]  ;;  %v334_v20 = vld [vmem:[#allocation2 + $0x258] sm:$0xff]  ;;  %v1586_v0 = vpack.c.bf16 %v362_v59, %v358_v58  ;;  %v396_v59 = vld [vmem:[#allocation2 + $0x448] sm:$0xff] }
 0x118   : > { %v585_v25 = vmax.f32 %v573_v18, 0.0  ;;  %v584_v26 = vmax.f32 %v498_v19, 0.0  ;;  %v332_v18 = vld [vmem:[#allocation2 + $0x248] sm:$0xff]  ;;  %v393_v58 = vld [vmem:[#allocation2 + $0x430] sm:$0xff] }
 0x119   : > { %v586_v30 = vmax.f32 %v575_v22, 0.0  ;;  %v336_v19 = vld [vmem:[#allocation2 + $0x268] sm:$0xff]  ;;  %v1524_v22 = vpack.c.bf16 %v327_v10, %v323_v8  ;;  %v366_v8 = vld [vmem:[#allocation2 + $0x358] sm:$0xff] }
 0x11a   : > { %v1428_v37 = vcombine.low %v583_v21, %v584_v26  ;;  %v1436_v3 = vcombine.high %v583_v21, %v584_v26  ;;  %v338_v21 = vld [vmem:[#allocation2 + $0x278] sm:$0xff]  ;;  %v331_v26 = vld [vmem:[#allocation2 + $0x240] sm:$0xff]  ;;  %v1526_v28 = vpack.c.bf16 %v336_v19, %v332_v18 }
 0x11b   : > { %v1429_v44 = vcombine.low %v585_v25, %v586_v30  ;;  %v1437_v45 = vcombine.high %v585_v25, %v586_v30  ;;  %v1540_v25 = vpack.c.bf16 %v329_v17, %v325_v16  ;;  %v1542_v29 = vpack.c.bf16 %v338_v21, %v334_v20  ;;  %v333_v30 = vld [vmem:[#allocation2 + $0x250] sm:$0xff]  ;;  %v370_v10 = vld [vmem:[#allocation2 + $0x378] sm:$0xff]  ;;  %v363_v16 = vld [vmem:[#allocation2 + $0x340] sm:$0xff] }
 0x11c   : > { %v501_v27 = vpop.f32.mrb[2].mxu0  ;;  %1251 = vst [vmem:[%s2001_s7] sm:$0xff] %v1428_v37  ;;  %1259 = vst [vmem:[%s2001_s7 + $0x40] sm:$0xff] %v1436_v3  ;;  %v367_v17 = vld [vmem:[#allocation2 + $0x360] sm:$0xff]  ;;  %v1590_v19 = vpack.c.bf16 %v370_v10, %v366_v8  ;;  %v365_v20 = vld [vmem:[#allocation2 + $0x350] sm:$0xff] }
 0x11d   : > { %v502_v31 = vadd.f32 %v501_v27, %v1982_v24  ;;  %v578_v32 = vpop.f32.mrb[2].mxu1  ;;  %v503_v33 = vpop.f32.mrb[3].mxu0  ;;  %1252 = vst [vmem:[%s2001_s7 + $0x8] sm:$0xff] %v1429_v44  ;;  %1260 = vst [vmem:[%s2001_s7 + $0x48] sm:$0xff] %v1437_v45  ;;  %v335_v27 = vld [vmem:[#allocation2 + $0x260] sm:$0xff]  ;;  %v348_v44 = vld [vmem:[#allocation2 + $0x2c8] sm:$0xff] }
 0x11e   : > { %v579_v38 = vadd.f32 %v578_v32, %v1984_v11  ;;  %v504_v39 = vadd.f32 %v503_v33, %v1986_v12  ;;  %v580_v40 = vpop.f32.mrb[3].mxu1  ;;  %v340_v32 = vld [vmem:[#allocation2 + $0x288] sm:$0xff]  ;;  %v1528_v37 = vpack.c.bf16 %v335_v27, %v331_v26  ;;  %v369_v21 = vld [vmem:[#allocation2 + $0x370] sm:$0xff]  ;;  %v374_v26 = vld [vmem:[#allocation2 + $0x398] sm:$0xff] }
 0x11f   : > { %v587_v46 = vmax.f32 %v502_v31, 0.0  ;;  %v581_v48 = vadd.f32 %v580_v40, %v1989_v13  ;;  %v337_v31 = vld [vmem:[#allocation2 + $0x270] sm:$0xff]  ;;  %v1578_v40 = vpack.c.bf16 %v346_v36, %v342_v35  ;;  %v352_v45 = vld [vmem:[#allocation2 + $0x2e8] sm:$0xff]  ;;  %v378_v27 = vld [vmem:[#allocation2 + $0x3b8] sm:$0xff] }
 0x120   : > { %v589_v49 = vmax.f32 %v579_v38, 0.0  ;;  %v588_v50 = vmax.f32 %v504_v39, 0.0  ;;  %v1544_v3 = vpack.c.bf16 %v337_v31, %v333_v30  ;;  %v339_v38 = vld [vmem:[#allocation2 + $0x280] sm:$0xff]  ;;  %v1546_v39 = vpack.c.bf16 %v344_v34, %v340_v32  ;;  %v373_v34 = vld [vmem:[#allocation2 + $0x390] sm:$0xff]  ;;  %v380_v36 = vld [vmem:[#allocation2 + $0x3c8] sm:$0xff] }
 0x121   : > { %v590_v54 = vmax.f32 %v581_v48, 0.0  ;;  %v354_v48 = vld [vmem:[#allocation2 + $0x2f8] sm:$0xff]  ;;  %v371_v30 = vld [vmem:[#allocation2 + $0x380] sm:$0xff]  ;;  %v377_v35 = vld [vmem:[#allocation2 + $0x3b0] sm:$0xff] }
 0x122   : > { %v1444_v61 = vcombine.low %v587_v46, %v588_v50  ;;  %v1452_v62 = vcombine.high %v587_v46, %v588_v50  ;;  %v350_v46 = vld [vmem:[#allocation2 + $0x2d8] sm:$0xff]  ;;  %v1580_v50 = vpack.c.bf16 %v345_v43, %v341_v42  ;;  %v375_v31 = vld [vmem:[#allocation2 + $0x3a0] sm:$0xff]  ;;  %v401_v8 = vld [vmem:[#allocation2 + $0x470] sm:$0xff] }
 0x123   : > { %v1445_v4 = vcombine.low %v589_v49, %v590_v54  ;;  %v1453_v5 = vcombine.high %v589_v49, %v590_v54  ;;  %v1548_v49 = vpack.c.bf16 %v343_v41, %v339_v38  ;;  %v356_v54 = vld [vmem:[#allocation2 + $0x308] sm:$0xff]  ;;  %v386_v38 = vld [vmem:[#allocation2 + $0x3f8] sm:$0xff]  ;;  %v379_v41 = vld [vmem:[#allocation2 + $0x3c0] sm:$0xff] }
 0x124   : > { %1267 = vst [vmem:[%s2001_s7 + $0x80] sm:$0xff] %v1444_v61  ;;  %1275 = vst [vmem:[%s2001_s7 + $0xc0] sm:$0xff] %v1452_v62  ;;  %v1584_v62 = vpack.c.bf16 %v353_v53, %v349_v52  ;;  %v1554_v2 = vpack.c.bf16 %v360_v57, %v356_v54  ;;  %v383_v42 = vld [vmem:[#allocation2 + $0x3e0] sm:$0xff]  ;;  %v389_v57 = vld [vmem:[#allocation2 + $0x410] sm:$0xff] }
 0x125   : > { %1268 = vst [vmem:[%s2001_s7 + $0x88] sm:$0xff] %v1445_v4  ;;  %1276 = vst [vmem:[%s2001_s7 + $0xc8] sm:$0xff] %v1453_v5  ;;  %v357_v4 = vld [vmem:[#allocation2 + $0x310] sm:$0xff]  ;;  %v387_v53 = vld [vmem:[#allocation2 + $0x400] sm:$0xff] }
 0x126   : > { %v361_v5 = vld [vmem:[#allocation2 + $0x330] sm:$0xff]  ;;  %v391_v54 = vld [vmem:[#allocation2 + $0x420] sm:$0xff] }
 0x12a   : > { %v610_v63 = vpop.permute.xlu0 %609 }
 0x12b   : > { %1388 = vmatmul.mubr.msk.f32.vlgmr.msra.gmra.mrb[4].mxu0 %vm253_vm4, %v610_v63  ;;  %1390 = vmatmul.mubr.msk.f32.vlgmr.msra.gmra.mrb[4].mxu1 %vm253_vm4, %v610_v63  ;;  %v355_v63 = vld [vmem:[#allocation2 + $0x300] sm:$0xff] }
 0x12c   : > { %1517 = vmatpush1.bf16.msra.mxu0 %v1516_v51  ;;  %1533 = vmatpush1.bf16.msra.mxu1 %v1532_v47  ;;  %v347_v51 = vld [vmem:[#allocation2 + $0x2c0] sm:$0xff] }
 0x12d   : > { %1519 = vmatprep.subr.bf16.mxu0 %v1518_v55  ;;  %1535 = vmatprep.subr.bf16.mxu1 %v1534_v56  ;;  %v351_v47 = vld [vmem:[#allocation2 + $0x2e0] sm:$0xff]  ;;  %v1550_v55 = vpack.c.bf16 %v352_v45, %v348_v44  ;;  %v1582_v56 = vpack.c.bf16 %v354_v48, %v350_v46  ;;  %v381_v45 = vld [vmem:[#allocation2 + $0x3d0] sm:$0xff]  ;;  %v388_v48 = vld [vmem:[#allocation2 + $0x408] sm:$0xff] }
 0x12e   : > { %687 = vmatprep.mubr.f32.mxu0 %v1779_v9  ;;  %764 = vmatprep.mubr.f32.mxu1 %v1779_v9  ;;  %v1552_v61 = vpack.c.bf16 %v351_v47, %v347_v51  ;;  %v385_v46 = vld [vmem:[#allocation2 + $0x3f0] sm:$0xff]  ;;  %v394_v51 = vld [vmem:[#allocation2 + $0x438] sm:$0xff]  ;;  %v1568_v47 = vpack.c.bf16 %v383_v42, %v379_v41 }
 0x12f   : > { %v1600_v52 = vpack.c.bf16 %v385_v46, %v381_v45 }
 0x130   : > { %1521 = vmatpush1.bf16.msra.mxu0 %v1520_v6  ;;  %1537 = vmatpush1.bf16.msra.mxu1 %v1536_v7  ;;  %v364_v6 = vld [vmem:[#allocation2 + $0x348] sm:$0xff] }
 0x131   : > { %1523 = vmatprep.subr.bf16.mxu0 %v1522_v14  ;;  %1539 = vmatprep.subr.bf16.mxu1 %v1538_v15  ;;  %v368_v7 = vld [vmem:[#allocation2 + $0x368] sm:$0xff]  ;;  %v1556_v14 = vpack.c.bf16 %v359_v1, %v355_v63  ;;  %v1588_v15 = vpack.c.bf16 %v361_v5, %v357_v4  ;;  %v402_v63 = vld [vmem:[#allocation2 + $0x478] sm:$0xff]  ;;  %v1572_v1 = vpack.c.bf16 %v391_v54, %v387_v53 }
 0x132   : > { %v612_v33 = vpop.permute.xlu1 %611  ;;  %v1558_v18 = vpack.c.bf16 %v368_v7, %v364_v6  ;;  %v399_v6 = vld [vmem:[#allocation2 + $0x460] sm:$0xff]  ;;  %v397_v7 = vld [vmem:[#allocation2 + $0x450] sm:$0xff] }
 0x133   : > { %1389 = vmatmul.mubr.msk.f32.gmra.mrb[6].mxu0 %vm253_vm4, %v612_v33  ;;  %1391 = vmatmul.mubr.msk.f32.gmra.mrb[6].mxu1 %vm253_vm4, %v612_v33  ;;  %v1594_v33 = vpack.c.bf16 %v378_v27, %v374_v26 }
 0x134   : > { %1525 = vmatpush1.bf16.msra.mxu0 %v1524_v22  ;;  %1541 = vmatpush1.bf16.msra.mxu1 %v1540_v25  ;;  %v372_v22 = vld [vmem:[#allocation2 + $0x388] sm:$0xff] }
 0x135   : > { %1527 = vmatprep.subr.bf16.mxu0 %v1526_v28  ;;  %1543 = vmatprep.subr.bf16.mxu1 %v1542_v29  ;;  %v376_v25 = vld [vmem:[#allocation2 + $0x3a8] sm:$0xff]  ;;  %v1560_v28 = vpack.c.bf16 %v367_v17, %v363_v16  ;;  %v1592_v29 = vpack.c.bf16 %v369_v21, %v365_v20 }
 0x136   : > { %863 = vmatprep.mubr.f32.mxu0 %v1779_v9  ;;  %940 = vmatprep.mubr.f32.mxu1 %v1779_v9  ;;  %v1562_v32 = vpack.c.bf16 %v376_v25, %v372_v22 }
 0x138   : > { %1529 = vmatpush1.bf16.msra.mxu0 %v1528_v37  ;;  %1545 = vmatpush1.bf16.msra.mxu1 %v1544_v3  ;;  %v384_v37 = vld [vmem:[#allocation2 + $0x3e8] sm:$0xff]  ;;  %v382_v3 = vld [vmem:[#allocation2 + $0x3d8] sm:$0xff] }
 0x139   : > { %1547 = vmatprep.subr.bf16.mxu0 %v1546_v39  ;;  %1579 = vmatprep.subr.bf16.mxu1 %v1578_v40  ;;  %v1564_v39 = vpack.c.bf16 %v375_v31, %v371_v30  ;;  %v1596_v40 = vpack.c.bf16 %v377_v35, %v373_v34  ;;  %v1566_v43 = vpack.c.bf16 %v384_v37, %v380_v36 }
 0x13a   : > { %v1598_v44 = vpack.c.bf16 %v386_v38, %v382_v3 }
 0x13b   : > { %1392 = vmatmul.mubr.msk.f32.vlgmr.msra.gmra.mrb[8].mxu0 %vm253_vm4, %v1966_v60  ;;  %1394 = vmatmul.mubr.msk.f32.vlgmr.msra.gmra.mrb[8].mxu1 %vm253_vm4, %v1966_v60 }
 0x13c   : > { %1549 = vmatpush1.bf16.msra.mxu0 %v1548_v49  ;;  %1581 = vmatpush1.bf16.msra.mxu1 %v1580_v50  ;;  %v392_v49 = vld [vmem:[#allocation2 + $0x428] sm:$0xff]  ;;  %v390_v50 = vld [vmem:[#allocation2 + $0x418] sm:$0xff] }
 0x13d   : > { %869 = vmatprep.mubr.f32.mxu0 %v1779_v9  ;;  %946 = vmatprep.mubr.f32.mxu1 %v1779_v9 }
 0x13e   : > { %1551 = vmatprep.subr.bf16.mxu0 %v1550_v55  ;;  %1583 = vmatprep.subr.bf16.mxu1 %v1582_v56  ;;  %v1570_v55 = vpack.c.bf16 %v392_v49, %v388_v48  ;;  %v1602_v56 = vpack.c.bf16 %v394_v51, %v390_v50 }
 0x13f   : > { %1393 = vmatmul.mubr.msk.f32.gmra.mrb[10].mxu0 %vm253_vm4, %v1975_v23  ;;  %1395 = vmatmul.mubr.msk.f32.gmra.mrb[10].mxu1 %vm253_vm4, %v1975_v23 }
 0x140   : > { %1553 = vmatpush1.bf16.msra.mxu0 %v1552_v61  ;;  %1585 = vmatpush1.bf16.msra.mxu1 %v1584_v62  ;;  %v400_v61 = vld [vmem:[#allocation2 + $0x468] sm:$0xff]  ;;  %v398_v62 = vld [vmem:[#allocation2 + $0x458] sm:$0xff] }
 0x141   : > { %1555 = vmatprep.subr.bf16.mxu0 %v1554_v2  ;;  %1587 = vmatprep.subr.bf16.mxu1 %v1586_v0  ;;  %v1604_v2 = vpack.c.bf16 %v393_v58, %v389_v57  ;;  %v395_v0 = vld [vmem:[#allocation2 + $0x440] sm:$0xff]  ;;  %v1574_v4 = vpack.c.bf16 %v400_v61, %v396_v59  ;;  %v1606_v5 = vpack.c.bf16 %v402_v63, %v398_v62 }
 0x142   : > { %1041 = vmatprep.mubr.f32.mxu0 %v1779_v9  ;;  %1118 = vmatprep.mubr.f32.mxu1 %v1779_v9  ;;  %v1576_v10 = vpack.c.bf16 %v399_v6, %v395_v0 }
 0x144   : > { %1557 = vmatpush1.bf16.msra.mxu0 %v1556_v14  ;;  %1589 = vmatpush1.bf16.msra.mxu1 %v1588_v15  ;;  %v1608_v14 = vpack.c.bf16 %v401_v8, %v397_v7 }
 0x145   : > { %1559 = vmatprep.subr.bf16.mxu0 %v1558_v18  ;;  %1591 = vmatprep.subr.bf16.mxu1 %v1590_v19 }
 0x148   : > { %1561 = vmatpush1.bf16.msra.mxu0 %v1560_v28  ;;  %1593 = vmatpush1.bf16.msra.mxu1 %v1592_v29 }
 0x149   : > { %1563 = vmatprep.subr.bf16.mxu0 %v1562_v32  ;;  %1595 = vmatprep.subr.bf16.mxu1 %v1594_v33 }
 0x14c   : > { %1565 = vmatpush1.bf16.msra.mxu0 %v1564_v39  ;;  %1597 = vmatpush1.bf16.msra.mxu1 %v1596_v40 }
 0x14d   : > { %1567 = vmatprep.subr.bf16.mxu0 %v1566_v43  ;;  %1599 = vmatprep.subr.bf16.mxu1 %v1598_v44 }
 0x150   : > { %1569 = vmatpush1.bf16.msra.mxu0 %v1568_v47  ;;  %1601 = vmatpush1.bf16.msra.mxu1 %v1600_v52 }
 0x151   : > { %1571 = vmatprep.subr.bf16.mxu0 %v1570_v55  ;;  %1603 = vmatprep.subr.bf16.mxu1 %v1602_v56 }
 0x154   : > { %1573 = vmatpush1.bf16.msra.mxu0 %v1572_v1  ;;  %1605 = vmatpush1.bf16.msra.mxu1 %v1604_v2 }
 0x155   : > { %1575 = vmatprep.subr.bf16.mxu0 %v1574_v4  ;;  %1607 = vmatprep.subr.bf16.mxu1 %v1606_v5 }
 0x158   : > { %1577 = vmatpush1.bf16.msra.mxu0 %v1576_v10  ;;  %1609 = vmatpush1.bf16.msra.mxu1 %v1608_v14 }
 0x15b   : > { %1042 = vmatmul.mubr.f32.vlgmr.msra.gmra.mrb[12].mxu0 %v1966_v60  ;;  %1119 = vmatmul.mubr.f32.vlgmr.msra.gmra.mrb[12].mxu1 %v1966_v60 }
 0x15c   : > { %1047 = vmatprep.mubr.f32.mxu0 %v1779_v9  ;;  %1124 = vmatprep.mubr.f32.mxu1 %v1779_v9 }
 0x15f   : > { %1048 = vmatmul.mubr.f32.gmra.mrb[14].mxu0 %v1975_v23  ;;  %1125 = vmatmul.mubr.f32.gmra.mrb[14].mxu1 %v1975_v23 }
 0x1fe   : > { %v683_v15 = vpop.f32.mrb[4].mxu0  ;;  %v760_v16 = vpop.f32.mrb[4].mxu1 }
 0x1ff   : > { %v684_v17 = vadd.f32 %v683_v15, %v1982_v24  ;;  %v761_v18 = vadd.f32 %v760_v16, %v1984_v11  ;;  %v685_v19 = vpop.f32.mrb[5].mxu0  ;;  %v762_v60 = vpop.f32.mrb[5].mxu1 }
 0x200   : > { %v686_v20 = vadd.f32 %v685_v19, %v1986_v12  ;;  %v763_v9 = vadd.f32 %v762_v60, %v1989_v13 }
 0x201   : > { %v771_v21 = vmax.f32 %v684_v17, 0.0  ;;  %v773_v22 = vmax.f32 %v761_v18, 0.0 }
 0x202   : > { %v772_v25 = vmax.f32 %v686_v20, 0.0  ;;  %v774_v23 = vmax.f32 %v763_v9, 0.0 }
 0x204   : > { %v1430_v26 = vcombine.low %v771_v21, %v772_v25  ;;  %v1438_v27 = vcombine.high %v771_v21, %v772_v25  ;;  %v1431_v28 = vcombine.low %v773_v22, %v774_v23  ;;  %v1439_v29 = vcombine.high %v773_v22, %v774_v23 }
 0x206   : > { %1253 = vst [vmem:[%s2001_s7 + $0x10] sm:$0xff] %v1430_v26  ;;  %1261 = vst [vmem:[%s2001_s7 + $0x50] sm:$0xff] %v1438_v27  ;;  %v689_v30 = vpop.f32.mrb[6].mxu0  ;;  %v766_v31 = vpop.f32.mrb[6].mxu1 }
 0x207   : > { %1254 = vst [vmem:[%s2001_s7 + $0x18] sm:$0xff] %v1431_v28  ;;  %1262 = vst [vmem:[%s2001_s7 + $0x58] sm:$0xff] %v1439_v29  ;;  %v690_v32 = vadd.f32 %v689_v30, %v1982_v24  ;;  %v767_v33 = vadd.f32 %v766_v31, %v1984_v11  ;;  %v691_v34 = vpop.f32.mrb[7].mxu0  ;;  %v768_v35 = vpop.f32.mrb[7].mxu1 }
 0x208   : > { %v692_v36 = vadd.f32 %v691_v34, %v1986_v12  ;;  %v769_v37 = vadd.f32 %v768_v35, %v1989_v13 }
 0x209   : > { %v775_v3 = vmax.f32 %v690_v32, 0.0  ;;  %v777_v38 = vmax.f32 %v767_v33, 0.0 }
 0x20a   : > { %v776_v39 = vmax.f32 %v692_v36, 0.0  ;;  %v778_v40 = vmax.f32 %v769_v37, 0.0 }
 0x20c   : > { %v1446_v41 = vcombine.low %v775_v3, %v776_v39  ;;  %v1454_v42 = vcombine.high %v775_v3, %v776_v39  ;;  %v1447_v43 = vcombine.low %v777_v38, %v778_v40  ;;  %v1455_v44 = vcombine.high %v777_v38, %v778_v40 }
 0x20e   : > { %1269 = vst [vmem:[%s2001_s7 + $0x90] sm:$0xff] %v1446_v41  ;;  %1277 = vst [vmem:[%s2001_s7 + $0xd0] sm:$0xff] %v1454_v42  ;;  %v865_v45 = vpop.f32.mrb[8].mxu0  ;;  %v942_v46 = vpop.f32.mrb[8].mxu1 }
 0x20f   : > { %1270 = vst [vmem:[%s2001_s7 + $0x98] sm:$0xff] %v1447_v43  ;;  %1278 = vst [vmem:[%s2001_s7 + $0xd8] sm:$0xff] %v1455_v44  ;;  %v866_v48 = vadd.f32 %v865_v45, %v1982_v24  ;;  %v943_v49 = vadd.f32 %v942_v46, %v1984_v11  ;;  %v867_v50 = vpop.f32.mrb[9].mxu0  ;;  %v944_v51 = vpop.f32.mrb[9].mxu1 }
 0x210   : > { %v868_v47 = vadd.f32 %v867_v50, %v1986_v12  ;;  %v945_v52 = vadd.f32 %v944_v51, %v1989_v13 }
 0x211   : > { %v953_v53 = vmax.f32 %v866_v48, 0.0  ;;  %v955_v54 = vmax.f32 %v943_v49, 0.0 }
 0x212   : > { %v954_v55 = vmax.f32 %v868_v47, 0.0  ;;  %v956_v56 = vmax.f32 %v945_v52, 0.0  ;;  %v871_v57 = vpop.f32.mrb[10].mxu0  ;;  %v948_v58 = vpop.f32.mrb[10].mxu1 }
 0x213   : > { %v872_v59 = vadd.f32 %v871_v57, %v1982_v24  ;;  %v949_v61 = vadd.f32 %v948_v58, %v1984_v11  ;;  %v873_v62 = vpop.f32.mrb[11].mxu0  ;;  %v950_v63 = vpop.f32.mrb[11].mxu1 }
 0x214   : > { %v1432_v1 = vcombine.low %v953_v53, %v954_v55  ;;  %v1440_v2 = vcombine.high %v953_v53, %v954_v55  ;;  %v1433_v0 = vcombine.low %v955_v54, %v956_v56  ;;  %v1441_v4 = vcombine.high %v955_v54, %v956_v56 }
 0x215   : > { %v957_v5 = vmax.f32 %v872_v59, 0.0  ;;  %v959_v6 = vmax.f32 %v949_v61, 0.0  ;;  %v874_v7 = vadd.f32 %v873_v62, %v1986_v12  ;;  %v951_v8 = vadd.f32 %v950_v63, %v1989_v13 }
 0x216   : > { %1255 = vst [vmem:[%s2001_s7 + $0x20] sm:$0xff] %v1432_v1  ;;  %1263 = vst [vmem:[%s2001_s7 + $0x60] sm:$0xff] %v1440_v2 }
 0x217   : > { %1256 = vst [vmem:[%s2001_s7 + $0x28] sm:$0xff] %v1433_v0  ;;  %1264 = vst [vmem:[%s2001_s7 + $0x68] sm:$0xff] %v1441_v4  ;;  %v958_v10 = vmax.f32 %v874_v7, 0.0  ;;  %v960_v14 = vmax.f32 %v951_v8, 0.0 }
 0x219   : > { %v1448_v15 = vcombine.low %v957_v5, %v958_v10  ;;  %v1456_v16 = vcombine.high %v957_v5, %v958_v10  ;;  %v1449_v17 = vcombine.low %v959_v6, %v960_v14  ;;  %v1457_v18 = vcombine.high %v959_v6, %v960_v14 }
 0x21b   : > { %1271 = vst [vmem:[%s2001_s7 + $0xa0] sm:$0xff] %v1448_v15  ;;  %1279 = vst [vmem:[%s2001_s7 + $0xe0] sm:$0xff] %v1456_v16 }
 0x21c   : > { %1272 = vst [vmem:[%s2001_s7 + $0xa8] sm:$0xff] %v1449_v17  ;;  %1280 = vst [vmem:[%s2001_s7 + $0xe8] sm:$0xff] %v1457_v18 }
 0x22e   : > { %v1043_v19 = vpop.f32.mrb[12].mxu0  ;;  %v1120_v60 = vpop.f32.mrb[12].mxu1 }
 0x22f   : > { %v1044_v20 = vadd.f32 %v1043_v19, %v1982_v24  ;;  %v1121_v9 = vadd.f32 %v1120_v60, %v1984_v11  ;;  %v1045_v21 = vpop.f32.mrb[13].mxu0  ;;  %v1122_v22 = vpop.f32.mrb[13].mxu1 }
 0x230   : > { %v1046_v25 = vadd.f32 %v1045_v21, %v1986_v12  ;;  %v1123_v23 = vadd.f32 %v1122_v22, %v1989_v13 }
 0x231   : > { %v1131_v26 = vmax.f32 %v1044_v20, 0.0  ;;  %v1133_v27 = vmax.f32 %v1121_v9, 0.0 }
 0x232   : > { %v1132_v28 = vmax.f32 %v1046_v25, 0.0  ;;  %v1134_v29 = vmax.f32 %v1123_v23, 0.0  ;;  %v1049_v30 = vpop.f32.mrb[14].mxu0  ;;  %v1126_v31 = vpop.f32.mrb[14].mxu1 }
 0x233   : > { %v1050_v32 = vadd.f32 %v1049_v30, %v1982_v24  ;;  %v1127_v33 = vadd.f32 %v1126_v31, %v1984_v11  ;;  %v1051_v34 = vpop.f32.mrb[15].mxu0  ;;  %v1128_v35 = vpop.f32.mrb[15].mxu1 }
 0x234   : > { %v1434_v36 = vcombine.low %v1131_v26, %v1132_v28  ;;  %v1442_v37 = vcombine.high %v1131_v26, %v1132_v28  ;;  %v1435_v3 = vcombine.low %v1133_v27, %v1134_v29  ;;  %v1443_v38 = vcombine.high %v1133_v27, %v1134_v29 }
 0x235   : > { %v1135_v39 = vmax.f32 %v1050_v32, 0.0  ;;  %v1137_v40 = vmax.f32 %v1127_v33, 0.0  ;;  %v1052_v41 = vadd.f32 %v1051_v34, %v1986_v12  ;;  %v1129_v42 = vadd.f32 %v1128_v35, %v1989_v13 }
 0x236   : > { %1257 = vst [vmem:[%s2001_s7 + $0x30] sm:$0xff] %v1434_v36  ;;  %1265 = vst [vmem:[%s2001_s7 + $0x70] sm:$0xff] %v1442_v37 }
 0x237   : > { %1258 = vst [vmem:[%s2001_s7 + $0x38] sm:$0xff] %v1435_v3  ;;  %1266 = vst [vmem:[%s2001_s7 + $0x78] sm:$0xff] %v1443_v38  ;;  %v1136_v24 = vmax.f32 %v1052_v41, 0.0  ;;  %v1138_v11 = vmax.f32 %v1129_v42, 0.0 }
 0x239   : > { %v1450_v12 = vcombine.low %v1135_v39, %v1136_v24  ;;  %v1458_v13 = vcombine.high %v1135_v39, %v1136_v24  ;;  %v1451_v43 = vcombine.low %v1137_v40, %v1138_v11  ;;  %v1459_v44 = vcombine.high %v1137_v40, %v1138_v11 }
 0x23b   : > { %1273 = vst [vmem:[%s2001_s7 + $0xb0] sm:$0xff] %v1450_v12  ;;  %1281 = vst [vmem:[%s2001_s7 + $0xf0] sm:$0xff] %v1458_v13 }
 0x23c   : > { %1274 = vst [vmem:[%s2001_s7 + $0xb8] sm:$0xff] %v1451_v43  ;;  %1282 = vst [vmem:[%s2001_s7 + $0xf8] sm:$0xff] %v1459_v44 }
 0x23d   : > { %1718 = shalt.err (!%p1715_p7)
}
 0x23e   : > { %s1719_s28 = scalar_lea.hbm %s2086_s17, 4096  ;;  %s1723_s30 = scalar_lea.hbm %s2141_s3, 8192 }
 0x23f   : > { %p1720_p8 = scmp.ne.s32.totalorder %s2086_s17, %s1719_s28  ;;  %p1724_p1 = scmp.lt.u32.totalorder %s2086_s17, %s2141_s3 }
 0x240   : > { %p1725_p0 = scmp.lt.u32.totalorder %s1723_s30, %s1719_s28  ;;  %p1727_p6 = scmp.lt.u32.totalorder %s1719_s28, %s2086_s17 }
 0x241   : > { %p1721_p11 = pnand %p1720_p8, %p2154_p9 }
 0x242   : > { %p1726_p5 = por %p1725_p0, %p1724_p1 }
 0x243   : > { %p1722_p13 = pneg %p1721_p11 }
 0x244   : > { %p1728_p10 = por %p1727_p6, %p1726_p5 }
 0x246   : > { %p1729_p12 = pnand %p1728_p10, %p1722_p13 }
 0x248   : > { %1732 = shalt.err (!%p1729_p12)
}
 0x249   : > { %s1781_s6 = smov 512  }
 0x24a   : > { %1615 = dma.vmem_to_hbm [thread:$0]  (%p2154_p9), %s2088_s9, 4096, %s2086_s17, %s2096_s16, %s1781_s6, %s1781_s6, %s1776_s24  }
 0x24b PF: > { %p1627_p2 = scmp.ge.s32.totalorder %s1771_s15, 2  ;;  %s1312_s7 = sand.u32 1, %s1759_s12  }
 0x24c   : > { %p2155_p3 = scmp.ne.s32.totalorder %s2146_s23, 0  ;;  %s1313_s8 = scalar_lea.sflag [#allocation4], %s1312_s7 }
 0x24e   : > { %p1622_p4 = pnand %p1627_p2, %p2155_p3 }
 0x250   : > { %1754 = dma.done.wait (!%p1622_p4), %s1313_s8, 4096  }
 0x251   : > { %1756 = vsyncadd (!%p1622_p4), %s1313_s8, 4294963200  ;;  %p14_p7 = scmp.ge.s32.totalorder %s1827_s18, 4   ;;  %s2156_s12 = smov %s1763_s13 }
 0x252   : > { %s2157_s13 = smov %s1767_s14  ;;  %s2158_s14 = smov %s1838_s21 }
 0x253   : > { %s2159_s15 = smov %s1827_s18  ;;  %16 = sbr.rel (!%p14_p7) target bundleno = 4 (0x4), region = 72 }
 0x25a   :  { %1318 = vsyncpa [#allocation3], 1 }
 0x25b   :  { %1320 = vsyncpa [#allocation3 + $0x1], 1 }
 0x25c   :  { %1321 = vsyncpa [#allocation4], 1 }
 0x25d   :  { %1323 = vsyncpa [#allocation4 + $0x1], 1 }

</bundles_post_ra>
